<compile_context>
chip_gen: v7x
topology: tpu7x:2x2x1
jax: 0.10.0
libtpu: 0.0.40
codegen_flags: <defaults>
</compile_context>

<pallas_src>
import functools

import jax
import jax.numpy as jnp
from jax.experimental import pallas as pl
from jax.experimental.pallas import tpu as pltpu

HIDDEN_DIM = 32
BATCH = 8
MAX_CHUNK_ROWS = 4096  # multiple of 128; "as big as fits comfortably"


def _round_up(n, m):
    return ((n + m - 1) // m) * m


def ce_linear_kernel(x_ref, w_ref, b_ref, y_ref, loss_ref, acc_ref, *, total_rows):
    # x_ref:   (CHUNK, H) f32  -- rows of x for this grid step
    # w_ref:   (H, H)     f32  -- PyTorch layout [out_features, in_features], resident
    # b_ref:   (H, 1)     f32  -- resident
    # y_ref:   (1, CHUNK) i32  -- class indices (padded entries hold 0, see wrapper)
    # loss_ref:(1,)       f32  -- SMEM scalar output (mean CE loss)
    # acc_ref: (1, CHUNK) f32  -- VMEM scratch: per-lane running loss sums
    i = pl.program_id(0)
    chunk = x_ref.shape[0]

    @pl.when(i == 0)
    def _():
        acc_ref[...] = jnp.zeros_like(acc_ref)

    # logits^T[h, r] = sum_k w[h, k] * x[r, k]   (== (x @ w.T).T, no transposes)
    # Shape (H, CHUNK): batch on the 128-lane axis, classes on sublanes.
    logits_t = jax.lax.dot_general(
        w_ref[...], x_ref[...],
        dimension_numbers=(((1,), (1,)), ((), ())),
        preferred_element_type=jnp.float32,
    ) + b_ref[...]                                                   # (H, CHUNK)

    # Numerically-stable per-example log-sum-exp over the class (sublane) axis.
    m = jnp.max(logits_t, axis=0, keepdims=True)                     # (1, CHUNK)
    lse = m + jnp.log(jnp.sum(jnp.exp(logits_t - m), axis=0, keepdims=True))

    # Gather logits^T[y[r], r] via a one-hot compare (no dynamic gather on TPU).
    cls = jax.lax.broadcasted_iota(jnp.int32, logits_t.shape, 0)     # (H, CHUNK)
    onehot = (cls == y_ref[...]).astype(jnp.float32)                 # (H, CHUNK)
    target = jnp.sum(logits_t * onehot, axis=0, keepdims=True)       # (1, CHUNK)

    # Mask padded rows with where (not *0) so garbage/Inf can never produce NaN.
    row = jax.lax.broadcasted_iota(jnp.int32, (1, chunk), 1) + i * chunk
    valid = row < total_rows                                         # (1, CHUNK)
    acc_ref[...] += jnp.where(valid, lse - target, 0.0)

    @pl.when(i == pl.num_programs(0) - 1)
    def _():
        loss_ref[0] = jnp.sum(acc_ref[...]) * (1.0 / float(total_rows))


def simple_model_loss(x, w, b, y, *, max_chunk_rows=MAX_CHUNK_ROWS):
    """Equivalent of SimpleModel.forward(x, y): CrossEntropyLoss(Linear(x), y)."""
    B, H = x.shape
    assert w.shape == (H, H) and b.shape == (H,) and y.shape == (B,)

    # Chunk selection: whole batch in one grid step whenever it fits; only pad
    # to the next multiple of 8 (or of chunk_rows in the rare multi-chunk case).
    b8 = _round_up(B, 8)
    if b8 <= max_chunk_rows:
        chunk_rows = b8
        num_chunks = 1
    else:
        chunk_rows = max_chunk_rows
        num_chunks = int(pl.cdiv(B, chunk_rows))
    n_pad = num_chunks * chunk_rows
    pad = n_pad - B

    x_f = x.astype(jnp.float32)
    y_i = y.astype(jnp.int32)
    if pad:
        # NOTE: padded y entries MUST stay a valid class index (0); correctness
        # of padded rows relies on this together with the in-kernel valid mask.
        x_f = jnp.pad(x_f, ((0, pad), (0, 0)))
        y_i = jnp.pad(y_i, ((0, pad),))
    y2 = y_i.reshape(1, n_pad)                 # batch on the lane axis
    b2 = b.astype(jnp.float32).reshape(H, 1)   # classes on sublanes

    kernel = functools.partial(ce_linear_kernel, total_rows=B)

    grid_spec = pltpu.PrefetchScalarGridSpec(
        num_scalar_prefetch=0,
        grid=(num_chunks,),
        in_specs=[
            pl.BlockSpec((chunk_rows, H), lambda i: (i, 0)),   # x: streamed rows
            pl.BlockSpec((H, H), lambda i: (0, 0)),            # w: resident
            pl.BlockSpec((H, 1), lambda i: (0, 0)),            # b: resident
            pl.BlockSpec((1, chunk_rows), lambda i: (0, i)),   # y: streamed, lane-dense
        ],
        out_specs=pl.BlockSpec(memory_space=pltpu.MemorySpace.SMEM),  # scalar loss
        scratch_shapes=[pltpu.VMEM((1, chunk_rows), jnp.float32)],    # per-row sums
    )

    loss = pl.pallas_call(
        kernel,
        out_shape=jax.ShapeDtypeStruct((1,), jnp.float32),
        grid_spec=grid_spec,
        compiler_params=pltpu.CompilerParams(
            # The (usually length-1) grid axis carries the resident accumulator.
            dimension_semantics=("arbitrary",),
        ),
    )(x_f, w.astype(jnp.float32), b2, y2)
    return loss[0]


def _reference_loss(x, w, b, y):
    logits = jnp.dot(x.astype(jnp.float32), w.astype(jnp.float32).T,
                     preferred_element_type=jnp.float32) + b
    lse = jax.scipy.special.logsumexp(logits, axis=-1)
    tgt = jnp.take_along_axis(logits, y[:, None], axis=-1)[:, 0]
    return jnp.mean(lse - tgt)


if __name__ == "__main__":
    key = jax.random.PRNGKey(0)
    kx, kw, kb, ky, kx2, ky2, kx3, ky3 = jax.random.split(key, 8)

    # Deterministic params (mimics torch.nn.Linear's U(-1/sqrt(H), 1/sqrt(H))).
    bound = 1.0 / (HIDDEN_DIM ** 0.5)
    w = jax.random.uniform(kw, (HIDDEN_DIM, HIDDEN_DIM), jnp.float32, -bound, bound)
    b = jax.random.uniform(kb, (HIDDEN_DIM,), jnp.float32, -bound, bound)

    # Nominal SimpleModel shape: batch=8, hidden=32 -> single 8-row grid step,
    # zero padding.
    x = jax.random.normal(kx, (BATCH, HIDDEN_DIM), jnp.float32)
    y = jax.random.randint(ky, (BATCH,), 0, HIDDEN_DIM, jnp.int32)
    loss = simple_model_loss(x, w, b, y)
    jax.block_until_ready(loss)
    ref = _reference_loss(x, w, b, y)
    assert jnp.allclose(loss, ref, atol=1e-5, rtol=1e-5), (loss, ref)

    # Larger batch (multiple of 8): still a single grid step, no padding,
    # lane-dense (32, 1000) compute.
    B2 = 1000
    x2 = jax.random.normal(kx2, (B2, HIDDEN_DIM), jnp.float32)
    y2 = jax.random.randint(ky2, (B2,), 0, HIDDEN_DIM, jnp.int32)
    loss2 = simple_model_loss(x2, w, b, y2)
    jax.block_until_ready(loss2)
    ref2 = _reference_loss(x2, w, b, y2)
    assert jnp.allclose(loss2, ref2, atol=1e-5, rtol=1e-5), (loss2, ref2)

    # Ragged multi-chunk path: exercises the grid loop, the resident VMEM
    # accumulator, the tail padding and the valid-row mask.
    B3 = 2500
    x3 = jax.random.normal(kx3, (B3, HIDDEN_DIM), jnp.float32)
    y3 = jax.random.randint(ky3, (B3,), 0, HIDDEN_DIM, jnp.int32)
    loss3 = simple_model_loss(x3, w, b, y3, max_chunk_rows=1024)
    jax.block_until_ready(loss3)
    ref3 = _reference_loss(x3, w, b, y3)
    assert jnp.allclose(loss3, ref3, atol=1e-5, rtol=1e-5), (loss3, ref3)

    print("KERNEL_OK")
</pallas_src>

<mosaic_0001>
module attributes {stable_mosaic.version = 11 : i64} {
  func.func @ce_linear_kernel(%arg0: i32, %arg1: memref<8x32xf32, #tpu.memory_space<vmem>>, %arg2: memref<32x32xf32, #tpu.memory_space<vmem>>, %arg3: memref<32x1xf32, #tpu.memory_space<vmem>>, %arg4: memref<1x8xi32, #tpu.memory_space<vmem>>, %arg5: memref<1xf32, #tpu.memory_space<smem>>, %arg6: memref<1x8xf32, #tpu.memory_space<vmem>>) attributes {dimension_semantics = [#tpu.dimension_semantics<arbitrary>], iteration_bounds = array<i64: 1>, scalar_prefetch = 0 : i64, scratch_operands = 1 : i64, tpu.core_type = #tpu.core_type<tc>, window_params = [{transform_indices = @transform_0, window_bounds = array<i64: 8, 32>}, {pipeline_mode = #tpu.pipeline_mode<synchronous>, transform_indices = @transform_1, window_bounds = array<i64: 32, 32>}, {pipeline_mode = #tpu.pipeline_mode<synchronous>, transform_indices = @transform_2, window_bounds = array<i64: 32, 1>}, {transform_indices = @transform_3, window_bounds = array<i64: 1, 8>}, {transform_indices = @transform_4, window_bounds = array<i64: 1>}]} {
    %c0_i32 = arith.constant 0 : i32
    %0 = arith.cmpi eq, %arg0, %c0_i32 : i32
    %1 = arith.extui %0 : i1 to i32
    %c0_i32_0 = arith.constant 0 : i32
    %2 = arith.cmpi ne, %1, %c0_i32_0 : i32
    scf.if %2 {
      %cst_19 = arith.constant 0.000000e+00 : f32
      %42 = vector.broadcast %cst_19 : f32 to vector<1x8xf32>
      %c0_20 = arith.constant 0 : index
      %c0_21 = arith.constant 0 : index
      %43 = vector.load %arg6[%c0_20, %c0_21] : memref<1x8xf32, #tpu.memory_space<vmem>>, vector<1x8xf32>
      tpu.vector_store %arg6[%c0_20, %c0_21], %42 {strides = array<i32>} : memref<1x8xf32, #tpu.memory_space<vmem>>, vector<1x8xf32>,
    } else {
    }
    %c0 = arith.constant 0 : index
    %c0_1 = arith.constant 0 : index
    %3 = vector.load %arg2[%c0, %c0_1] : memref<32x32xf32, #tpu.memory_space<vmem>>, vector<32x32xf32>
    %c0_2 = arith.constant 0 : index
    %c0_3 = arith.constant 0 : index
    %4 = vector.load %arg1[%c0_2, %c0_3] : memref<8x32xf32, #tpu.memory_space<vmem>>, vector<8x32xf32>
    %cst = arith.constant dense<0.000000e+00> : vector<32x8xf32>
    %5 = tpu.matmul %3, %4, %cst {dimension_numbers = #tpu.dot_dimension_numbers<[1], [1], [0], [0], [0, 0, 1, 0], [], []>} : vector<32x32xf32>, vector<8x32xf32>, vector<32x8xf32> -> vector<32x8xf32>
    %c0_4 = arith.constant 0 : index
    %c0_5 = arith.constant 0 : index
    %6 = vector.load %arg3[%c0_4, %c0_5] : memref<32x1xf32, #tpu.memory_space<vmem>>, vector<32x1xf32>
    %7 = vector.broadcast %6 : vector<32x1xf32> to vector<32x8xf32>
    %8 = arith.addf %5, %7 : vector<32x8xf32>
    %cst_6 = arith.constant dense<0xFF800000> : vector<8xf32>
    %9 = vector.multi_reduction <maximumf>, %8, %cst_6 [0] : vector<32x8xf32> to vector<8xf32>
    %10 = vector.shape_cast %9 : vector<8xf32> to vector<1x8xf32>
    %11 = vector.broadcast %10 : vector<1x8xf32> to vector<32x8xf32>
    %12 = arith.subf %8, %11 : vector<32x8xf32>
    %13 = math.exp %12 : vector<32x8xf32>
    %cst_7 = arith.constant dense<0.000000e+00> : vector<8xf32>
    %14 = vector.multi_reduction <add>, %13, %cst_7 [0] : vector<32x8xf32> to vector<8xf32>
    %15 = vector.shape_cast %14 : vector<8xf32> to vector<1x8xf32>
    %16 = math.log %15 : vector<1x8xf32>
    %17 = arith.addf %10, %16 : vector<1x8xf32>
    %18 = tpu.iota {dimensions = array<i32: 0>} : vector<32x8xi32>
    %c0_8 = arith.constant 0 : index
    %c0_9 = arith.constant 0 : index
    %19 = vector.load %arg4[%c0_8, %c0_9] : memref<1x8xi32, #tpu.memory_space<vmem>>, vector<1x8xi32>
    %20 = vector.broadcast %19 : vector<1x8xi32> to vector<32x8xi32>
    %21 = arith.cmpi eq, %18, %20 : vector<32x8xi32>
    %22 = arith.extui %21 : vector<32x8xi1> to vector<32x8xi32>
    %23 = arith.sitofp %22 : vector<32x8xi32> to vector<32x8xf32>
    %24 = arith.mulf %8, %23 : vector<32x8xf32>
    %cst_10 = arith.constant dense<0.000000e+00> : vector<8xf32>
    %25 = vector.multi_reduction <add>, %24, %cst_10 [0] : vector<32x8xf32> to vector<8xf32>
    %26 = vector.shape_cast %25 : vector<8xf32> to vector<1x8xf32>
    %27 = tpu.iota {dimensions = array<i32: 1>} : vector<1x8xi32>
    %c8_i32 = arith.constant 8 : i32
    %28 = arith.muli %arg0, %c8_i32 : i32
    %29 = vector.broadcast %28 : i32 to vector<1x8xi32>
    %30 = arith.addi %27, %29 : vector<1x8xi32>
    %c8_i32_11 = arith.constant 8 : i32
    %31 = vector.broadcast %c8_i32_11 : i32 to vector<1x8xi32>
    %32 = arith.cmpi slt, %30, %31 : vector<1x8xi32>
    %c0_12 = arith.constant 0 : index
    %c0_13 = arith.constant 0 : index
    %33 = vector.load %arg6[%c0_12, %c0_13] : memref<1x8xf32, #tpu.memory_space<vmem>>, vector<1x8xf32>
    %34 = arith.subf %17, %26 : vector<1x8xf32>
    %cst_14 = arith.constant 0.000000e+00 : f32
    %35 = vector.broadcast %cst_14 : f32 to vector<1x8xf32>
    %36 = arith.select %32, %34, %35 : vector<1x8xi1>, vector<1x8xf32>
    %37 = arith.addf %33, %36 : vector<1x8xf32>
    %c0_15 = arith.constant 0 : index
    %c0_16 = arith.constant 0 : index
    %38 = vector.load %arg6[%c0_15, %c0_16] : memref<1x8xf32, #tpu.memory_space<vmem>>, vector<1x8xf32>
    tpu.vector_store %arg6[%c0_15, %c0_16], %37 {strides = array<i32>} : memref<1x8xf32, #tpu.memory_space<vmem>>, vector<1x8xf32>,
    %c0_i32_17 = arith.constant 0 : i32
    %39 = arith.cmpi eq, %arg0, %c0_i32_17 : i32
    %40 = arith.extui %39 : i1 to i32
    %c0_i32_18 = arith.constant 0 : i32
    %41 = arith.cmpi ne, %40, %c0_i32_18 : i32
    scf.if %41 {
      %c0_19 = arith.constant 0 : index
      %c0_20 = arith.constant 0 : index
      %42 = vector.load %arg6[%c0_19, %c0_20] : memref<1x8xf32, #tpu.memory_space<vmem>>, vector<1x8xf32>
      %43 = vector.shape_cast %42 : vector<1x8xf32> to vector<1x1x8xf32>
      %cst_21 = arith.constant dense<0.000000e+00> : vector<1xf32>
      %44 = vector.multi_reduction <add>, %43, %cst_21 [1, 2] : vector<1x1x8xf32> to vector<1xf32>
      %45 = vector.shape_cast %44 : vector<1xf32> to vector<1x1x1xf32>
      %46 = vector.extract %45[0, 0, 0] : f32 from vector<1x1x1xf32>
      %cst_22 = arith.constant 1.250000e-01 : f32
      %47 = arith.mulf %46, %cst_22 : f32
      %c0_23 = arith.constant 0 : index
      %48 = memref.load %arg5[%c0_23] : memref<1xf32, #tpu.memory_space<smem>>
      memref.store %47, %arg5[%c0_23] : memref<1xf32, #tpu.memory_space<smem>>
    } else {
    }
    return
  }
  func.func @transform_0(%arg0: i32) -> (i32, i32) {
    %c0_i32 = arith.constant 0 : i32
    %c0_i32_0 = arith.constant 0 : i32
    return %arg0, %c0_i32 : i32, i32
  }
  func.func @transform_1(%arg0: i32) -> (i32, i32) {
    %c0_i32 = arith.constant 0 : i32
    %c0_i32_0 = arith.constant 0 : i32
    %c0_i32_1 = arith.constant 0 : i32
    return %c0_i32, %c0_i32_0 : i32, i32
  }
  func.func @transform_2(%arg0: i32) -> (i32, i32) {
    %c0_i32 = arith.constant 0 : i32
    %c0_i32_0 = arith.constant 0 : i32
    %c0_i32_1 = arith.constant 0 : i32
    return %c0_i32, %c0_i32_0 : i32, i32
  }
  func.func @transform_3(%arg0: i32) -> (i32, i32) {
    %c0_i32 = arith.constant 0 : i32
    %c0_i32_0 = arith.constant 0 : i32
    return %c0_i32, %arg0 : i32, i32
  }
  func.func @transform_4(%arg0: i32) -> i32 {
    %c0_i32 = arith.constant 0 : i32
    %c0_i32_0 = arith.constant 0 : i32
    return %c0_i32 : i32
  }
}

</mosaic_0001>

<bundles_post_ra>
// kernel: tpu_custom_call.1
= control target key start
LH: loop header
LB: loop body
LE: loop exit
PB: predicated region body
PF: predicated region fallthrough
CT: control target
= control target key end

     0   :  { %9 = vsyncpa [#allocation4], 0  ;;  %s474_s0 = inlined_call_operand.hbm [shape: f32[8,32], index: 0, kind: input, shape index: {}]   ;;  %s475_s1 = inlined_call_operand.vmem [shape: f32[32,32], index: 1, kind: input, shape index: {}]   ;;  %s476_s2 = inlined_call_operand.vmem [shape: f32[32,1], index: 2, kind: input, shape index: {}]   ;;  %s477_s3 = inlined_call_operand.vmem [shape: s32[1,8], index: 3, kind: input, shape index: {}]   ;;  %s478_s4 = inlined_call_operand.hbm [shape: f32[1], index: 4, kind: output, shape index: {}]  }
   0x1   :  { %10 = vsyncpa [#allocation5], 0  ;;  %s369_s15 = smov [#allocation3]   ;;  %s333_s19 = scalar_lea.hbm %s474_s0, 128 }
   0x2   :  { %s17_s16 = sshll.u32 %s369_s15, 4  ;;  %p334_p0 = scmp.ne.s32.totalorder %s474_s0, %s333_s19  ;;  %s18_s16 = int_to_ptr.vmem [resolvable:$true] %s17_s16 }
   0x3   :  { %p337_p1 = scmp.lt.u32.totalorder %s333_s19, %s474_s0 }
   0x5   :  { %p339_p2 = pnand %p337_p1, %p334_p0 }
   0x7   :  { %342 = shalt.err (!%p339_p2)
}
   0x8   :  { %s343_s24 = scalar_lea.vmem %s18_s16, 128  ;;  %p348_p4 = scmp.lt.s32.totalorder %s18_s16, %s18_s16 }
   0x9   :  { %p344_p3 = scmp.ne.s32.totalorder %s18_s16, %s343_s24  ;;  %p349_p5 = scmp.lt.s32.totalorder %s343_s24, %s343_s24 }
   0xb   :  { %p350_p6 = por %p349_p5, %p348_p4 }
   0xd   :  { %p351_p7 = pnand %p350_p6, %p344_p3 }
   0xf   :  { %354 = shalt.err (!%p351_p7)
}
  0x10   :  { %20 = dma.hbm_to_vmem [thread:$0]  %s474_s0, 128, %s18_s16, [#allocation4]  }
  0x11   :  { %365 = dma.done.wait [#allocation4], 128  }
  0x12   :  { %366 = vsyncadd [#allocation4], 4294967168  ;;  %v370_v0 = vmov 0   ;;  %vm65_vm0 = vcmask 261120   ;;  %v40_v1 = vld [vmem:[#allocation3] sm:$0xff]  ;;  %v38_v3 = vld [vmem:[%s475_s1 + $0x10] sm:$0xff]  ;;  %v208_v11 = vlaneseq }
  0x13   :  { %322 = vset.pattern.permute.xlu1 %v370_v0  ;;  %321 = vset.pattern.permute.xlu0 %v370_v0  ;;  %v36_v2 = vld [vmem:[%s475_s1] sm:$0xff]  ;;  %v43_v4 = vld [vmem:[%s476_s2 + $0x10] sm:$0xff]  ;;  %v37_v5 = vld [vmem:[%s475_s1 + $0x8] sm:$0xff]  ;;  %vm34_vm1 = vcmask 57344   ;;  %v371_v10 = vmov 0.0   ;;  %vm166_vm5 = vcmask 64512  }
  0x14   :  { %305 = vmatprep.subr.msk.mxu0 %vm65_vm0, %v40_v1  ;;  %313 = vmatprep.subr.msk.mxu1 %vm65_vm0, %v40_v1  ;;  %v39_v6 = vld [vmem:[%s475_s1 + $0x18] sm:$0xff]  ;;  %v41_v7 = vld [vmem:[%s476_s2] sm:$0xff]  ;;  %v42_v9 = vld [vmem:[%s476_s2 + $0x8] sm:$0xff]  ;;  %35 = vst.msk [vmem:[#allocation2] sm:$0x1] %vm34_vm1, %v371_v10  ;;  %v209_v12 = vshrl.u32 %v208_v11, 7 }
  0x15   :  { %306 = vmatpush3.xpose.msk.msra.mxu0 %vm65_vm0, %v40_v1  ;;  %314 = vmatpush3.xpose.msk.msra.mxu1 %vm65_vm0, %v40_v1  ;;  %v44_v8 = vld [vmem:[%s476_s2 + $0x18] sm:$0xff]  ;;  %v295_v16 = vld [vmem:[%s477_s3] ss:$0 sm:$0xff]  ;;  %s355_s19 = scalar_lea.hbm %s478_s4, 16 }
  0x16   :  { %307 = vmatprep.mubr.msk.f32.mxu0 %vm65_vm0, %v36_v2  ;;  %310 = vmatprep.mubr.msk.f32.mxu1 %vm65_vm0, %v38_v3  ;;  %v210_v15 = vadd.s32 8, %v209_v12  ;;  %v211_v17 = vadd.s32 16, %v209_v12  ;;  %v212_v18 = vadd.s32 24, %v209_v12  ;;  %vm218_vm3 = vcmp.eq.s32.totalorder %v209_v12, %v295_v16  ;;  %p356_p8 = scmp.ne.s32.totalorder %s478_s4, %s355_s19  ;;  %p359_p9 = scmp.lt.u32.totalorder %s355_s19, %s478_s4 }
  0x17   :  { %57 = vperm.xlu1 %322, %v43_v4   ;;  %47 = vperm.xlu0 %321, %v41_v7   ;;  %v296_v27 = vsel %vm218_vm3, 1.0, %v371_v10 }
  0x18   :  { %308 = vmatmul.mubr.msk.f32.vlgmr.msra.gmra.mrb[0].mxu0 %vm65_vm0, %v37_v5  ;;  %311 = vmatmul.mubr.msk.f32.vlgmr.msra.gmra.mrb[0].mxu1 %vm65_vm0, %v39_v6  ;;  %vm219_vm2 = vcmp.eq.s32.totalorder %v210_v15, %v295_v16  ;;  %vm220_vm4 = vcmp.eq.s32.totalorder %v211_v17, %v295_v16  ;;  %vm221_vm6 = vcmp.eq.s32.totalorder %v212_v18, %v295_v16  ;;  %p361_p10 = pnand %p359_p9, %p356_p8 }
  0x19   :  { %v297_v22 = vsel %vm219_vm2, 1.0, %v371_v10  ;;  %v298_v29 = vsel %vm220_vm4, 1.0, %v371_v10  ;;  %v299_v35 = vsel %vm221_vm6, 1.0, %v371_v10 }
  0x1b   :  { %62 = vperm.xlu1 %322, %v44_v8   ;;  %52 = vperm.xlu0 %321, %v42_v9  }
  0x96   :  { %v58_v13 = vpop.permute.xlu1 %57  ;;  %v48_v14 = vpop.permute.xlu0 %47 }
  0x9a   :  { %v63_v19 = vpop.permute.xlu1 %62  ;;  %v53_v20 = vpop.permute.xlu0 %52 }
  0xeb   :  { %v309_v21 = vpop.f32.mrb[0].mxu0  ;;  %v312_v23 = vpop.f32.mrb[0].mxu1 }
  0xec   :  { %v153_v24 = vadd.f32 %v309_v21, %v53_v20  ;;  %v163_v25 = vadd.f32 %v312_v23, %v63_v19  ;;  %v147_v26 = vpop.f32.mrb[1].mxu0  ;;  %v157_v28 = vpop.f32.mrb[1].mxu1 }
  0xed   :  { %v148_v30 = vadd.f32 %v147_v26, %v48_v14  ;;  %v158_v31 = vadd.f32 %v157_v28, %v58_v13 }
  0xee   :  { %v168_v32 = vsel %vm166_vm5, %v153_v24, -inf  ;;  %v231_v33 = vmul.f32 %v297_v22, %v153_v24  ;;  %v170_v34 = vsel %vm166_vm5, %v163_v25, -inf  ;;  %v233_v43 = vmul.f32 %v299_v35, %v163_v25 }
  0xef   :  { %v167_v36 = vsel %vm166_vm5, %v148_v30, -inf  ;;  %v230_v37 = vmul.f32 %v296_v27, %v148_v30  ;;  %v169_v38 = vsel %vm166_vm5, %v158_v31, -inf  ;;  %v232_v39 = vmul.f32 %v298_v29, %v158_v31 }
  0xf0   :  { %v235_v40 = vsel %vm166_vm5, %v231_v33, 0.0  ;;  %v171_v41 = vmax.f32 %v167_v36, %v168_v32  ;;  %v172_v42 = vmax.f32 %v169_v38, %v170_v34  ;;  %v239_v50 = vsel %vm166_vm5, %v233_v43, 0.0 }
  0xf1   :  { %v234_v44 = vsel %vm166_vm5, %v230_v37, 0.0  ;;  %v237_v47 = vsel %vm166_vm5, %v232_v39, 0.0 }
  0xf2   :  { %v236_v45 = vadd.f32 %v235_v40, %v234_v44  ;;  %v173_v46 = vmax.f32 %v171_v41, %v172_v42 }
  0xf4   :  { %v174_v48 = vrot.slane %v173_v46, 4  ;;  %v238_v49 = vadd.f32 %v237_v47, %v236_v45 }
  0xf6   :  { %v175_v51 = vmax.f32 %v173_v46, %v174_v48  ;;  %v240_v52 = vadd.f32 %v239_v50, %v238_v49 }
  0xf8   :  { %v176_v53 = vrot.slane %v175_v51, 2  ;;  %v241_v16 = vrot.slane %v240_v52, 4 }
  0xfa   :  { %v177_v54 = vmax.f32 %v175_v51, %v176_v53  ;;  %v242_v19 = vadd.f32 %v241_v16, %v240_v52 }
  0xfc   :  { %v178_v55 = vrot.slane %v177_v54, 1  ;;  %v243_v21 = vrot.slane %v242_v19, 2 }
  0xfe   :  { %v179_v56 = vmax.f32 %v177_v54, %v178_v55  ;;  %v244_v22 = vadd.f32 %v243_v21, %v242_v19 }
 0x100   :  { %v180_v57 = vsub.f32 %v148_v30, %v179_v56  ;;  %v181_v58 = vsub.f32 %v153_v24, %v179_v56  ;;  %v182_v59 = vsub.f32 %v158_v31, %v179_v56  ;;  %v183_v60 = vsub.f32 %v163_v25, %v179_v56  ;;  %v253_v30 = vld [vmem:[#allocation2] sm:$0x1] }
 0x101   :  { %v245_v23 = vrot.slane %v244_v22, 1  ;;  %v248_v25 = vand.u32 127, %v208_v11 }
 0x102   :  { %v184_v61 = vmul.f32 1.442695, %v180_v57  ;;  %v186_v62 = vmul.f32 1.442695, %v181_v58  ;;  %v188_v63 = vmul.f32 1.442695, %v182_v59 }
 0x103   :  { %v190_v0 = vmul.f32 1.442695, %v183_v60  ;;  %v246_v28 = vadd.f32 %v245_v23, %v244_v22  ;;  %vm252_vm7 = vcmp.lt.s32.totalorder %v248_v25, 8 }
 0x104   :  { %323 = vpow2.f32 %v184_v61 }
 0x105   :  { %325 = vpow2.f32 %v186_v62 }
 0x106   :  { %327 = vpow2.f32 %v188_v63 }
 0x107   :  { %329 = vpow2.f32 %v190_v0 }
 0x10e   :  { %v324_v1 = vpop.eup %323 }
 0x10f   :  { %v326_v2 = vpop.eup %325  ;;  %v192_v3 = vsel %vm166_vm5, %v324_v1, 0.0 }
 0x110   :  { %v328_v4 = vpop.eup %327  ;;  %v193_v5 = vsel %vm166_vm5, %v326_v2, 0.0 }
 0x111   :  { %v330_v6 = vpop.eup %329  ;;  %v194_v7 = vadd.f32 %v193_v5, %v192_v3  ;;  %v195_v8 = vsel %vm166_vm5, %v328_v4, 0.0 }
 0x112   :  { %v197_v10 = vsel %vm166_vm5, %v330_v6, 0.0 }
 0x113   :  { %v196_v9 = vadd.f32 %v195_v8, %v194_v7 }
 0x115   :  { %v198_v12 = vadd.f32 %v197_v10, %v196_v9 }
 0x117   :  { %v199_v13 = vrot.slane %v198_v12, 4 }
 0x119   :  { %v200_v14 = vadd.f32 %v199_v13, %v198_v12 }
 0x11b   :  { %v201_v15 = vrot.slane %v200_v14, 2 }
 0x11d   :  { %v202_v17 = vadd.f32 %v201_v15, %v200_v14 }
 0x11f   :  { %v203_v18 = vrot.slane %v202_v17, 1 }
 0x121   :  { %v204_v20 = vadd.f32 %v203_v18, %v202_v17 }
 0x123   :  { %331 = vlog2.f32 %v204_v20 }
 0x12d   :  { %v332_v24 = vpop.eup %331 }
 0x12e   :  { %v206_v26 = vmul.f32 0.6931472, %v332_v24 }
 0x130   :  { %v207_v27 = vadd.f32 %v206_v26, %v179_v56 }
 0x132   :  { %v254_v29 = vsub.f32 %v207_v27, %v246_v28 }
 0x134   :  { %v255_v31 = vsel %vm252_vm7, %v254_v29, 0.0 }
 0x135   :  { %v256_v32 = vadd.f32 %v255_v31, %v253_v30 }
 0x137   :  { %258 = vst.msk [vmem:[#allocation2] sm:$0x1] %vm34_vm1, %v256_v32 }
 0x13e   :  { %v262_v33 = vld [vmem:[#allocation2] sm:$0x1] }
 0x13f   :  { %v263_v34 = vsel %vm34_vm1, %v262_v33, 0.0 }
 0x140   :  { %264 = vadd.xlane.f32.xlu0 %v263_v34 }
 0x1cd   :  { %v265_v35 = vpop.xlane.xlu0 %264 }
 0x1ce   :  { %v266_v36 = vrot.slane %v265_v35, 4 }
 0x1d0   :  { %v267_v37 = vadd.f32 %v266_v36, %v265_v35 }
 0x1d2   :  { %v268_v38 = vrot.slane %v267_v37, 2 }
 0x1d4   :  { %v269_v39 = vadd.f32 %v268_v38, %v267_v37 }
 0x1d6   :  { %v270_v11 = vrot.slane %v269_v39, 1 }
 0x1d8   :  { %v271_v40 = vadd.f32 %v270_v11, %v269_v39 }
 0x1da   :  { %315 = vpush %v271_v40 }
 0x20b   :  { %s316_s2 = spop %315 }
 0x20c   :  { %s273_s3 = smul.f32 0.125, %s316_s2 }
 0x20e   :  { %275 = sst [smem:[#allocation6]] %s273_s3 }
 0x20f   :  { %364 = shalt.err (!%p361_p10)
}
 0x210   :  { %s372_s24 = smov [#allocation6]  }
 0x211   :  { %283 = dma.smem_to_hbm %s372_s24, 16, %s478_s4, [#allocation5]  }
 0x212   :  { %367 = dma.done.wait [#allocation5], 16  }
 0x213   :  { %368 = vsyncadd [#allocation5], 4294967280 }
 0x214   :  { %287 = sfence }
 0x215   :  { %288 = vsyncpa [#allocation4], 1 }
 0x216   :  { %289 = vsyncpa [#allocation5], 1 }

</bundles_post_ra>
